<compile_context>
chip_gen: v7x
topology: tpu7x:2x2x1
jax: 0.10.0
libtpu: 0.0.40
codegen_flags: <defaults>
</compile_context>

<pallas_src>
import jax
import jax.numpy as jnp
from jax import lax
from jax.experimental import pallas as pl
from jax.experimental.pallas import tpu as pltpu


def _linear_l0_scale_kernel(x_ref, w_ref, b_ref, o_ref):
    """Fused: v2 = permute(x) @ W^T + b ; nnz = L0(v2) ; out = v2 * nnz.

    x_ref: (S, F)    f32 VMEM -- x1 with the unit batch squeezed, NOT transposed
    w_ref: (OUT, S)  f32 VMEM -- torch Linear weight, unmodified (out, in)
    b_ref: (1, OUT)  f32 VMEM -- bias row
    o_ref: (F, OUT)  f32 VMEM
    """
    x = x_ref[...]                     # (S, F)
    w = w_ref[...]                     # (OUT, S)

    # v2[f, o] = sum_s x[s, f] * w[o, s]
    # i.e. contract x's dim 0 (S) against w's dim 1 (in_features).  This encodes
    # both the permute(0,2,1) and the W^T of F.linear directly in the MXU op.
    v2 = lax.dot_general(
        x, w,
        dimension_numbers=(((0,), (1,)), ((), ())),
        preferred_element_type=jnp.float32,
    )                                   # (F, OUT)

    # Broadcast bias add (plain VPU add).
    v2 = v2 + b_ref[...]

    # torch.linalg.norm(v2, ord=0): number of nonzero elements (exact comparison
    # matches torch count-nonzero semantics; -0.0 counts as zero).
    nnz = jnp.sum(jnp.where(v2 != 0.0, 1.0, 0.0))

    o_ref[...] = (v2 * nnz).astype(o_ref.dtype)


@jax.jit
def model_forward(x1, weight, bias):
    B, S, F = x1.shape
    out_feat, in_feat = weight.shape
    if B != 1:
        # The reference module fixes batch == 1; make the assumption explicit.
        raise ValueError("model_forward assumes batch == 1 (as in the reference module)")
    if in_feat != S:
        raise ValueError("weight in_features must equal x1.shape[1]")

    # Only cheap bitcast-level prep outside the kernel: squeeze the unit batch dim
    # and present the bias as a (1, OUT) row.  No transposes in the wrapper.
    x2d = x1[0].astype(jnp.float32)                          # (S, F)
    w = weight.astype(jnp.float32)                           # (OUT, S)
    b2d = bias.astype(jnp.float32).reshape(1, out_feat)      # (1, OUT)

    out = pl.pallas_call(
        _linear_l0_scale_kernel,
        out_shape=jax.ShapeDtypeStruct((F, out_feat), jnp.float32),
        in_specs=[
            pl.BlockSpec(memory_space=pltpu.MemorySpace.VMEM),
            pl.BlockSpec(memory_space=pltpu.MemorySpace.VMEM),
            pl.BlockSpec(memory_space=pltpu.MemorySpace.VMEM),
        ],
        out_specs=pl.BlockSpec(memory_space=pltpu.MemorySpace.VMEM),
    )(x2d, w, b2d)

    # Re-attach the unit batch dim (bitcast) to match the reference output shape.
    return out[None]                                         # (1, F, OUT)


if __name__ == "__main__":
    key = jax.random.PRNGKey(0)
    kx, kw, kb = jax.random.split(key, 3)

    # Shapes implied by the module: x1 = (1, 2, 2), Linear(2, 2)
    x1 = jax.random.normal(kx, (1, 2, 2), dtype=jnp.float32)
    weight = jax.random.normal(kw, (2, 2), dtype=jnp.float32) * 0.5
    bias = jax.random.normal(kb, (2,), dtype=jnp.float32) * 0.1

    z1 = model_forward(x1, weight, bias)
    jax.block_until_ready(z1)

    # Pure-JAX reference check
    v1 = jnp.transpose(x1, (0, 2, 1))
    v2 = v1 @ weight.T + bias
    v4 = jnp.sum(jnp.where(v2 != 0.0, 1.0, 0.0))
    ref = v2 * v4
    assert z1.shape == ref.shape, (z1.shape, ref.shape)
    assert jnp.allclose(z1, ref, rtol=1e-5, atol=1e-5), (z1, ref)

    print("KERNEL_OK")
</pallas_src>

<mosaic_0001>
module attributes {stable_mosaic.version = 11 : i64} {
  func.func @_linear_l0_scale_kernel(%arg0: memref<2x2xf32, #tpu.memory_space<vmem>>, %arg1: memref<2x2xf32, #tpu.memory_space<vmem>>, %arg2: memref<1x2xf32, #tpu.memory_space<vmem>>, %arg3: memref<2x2xf32, #tpu.memory_space<vmem>>) attributes {dimension_semantics = [], scalar_prefetch = 0 : i64, scratch_operands = 0 : i64, tpu.core_type = #tpu.core_type<tc>} {
    %c0 = arith.constant 0 : index
    %c0_0 = arith.constant 0 : index
    %0 = vector.load %arg0[%c0, %c0_0] : memref<2x2xf32, #tpu.memory_space<vmem>>, vector<2x2xf32>
    %c0_1 = arith.constant 0 : index
    %c0_2 = arith.constant 0 : index
    %1 = vector.load %arg1[%c0_1, %c0_2] : memref<2x2xf32, #tpu.memory_space<vmem>>, vector<2x2xf32>
    %cst = arith.constant dense<0.000000e+00> : vector<2x2xf32>
    %2 = tpu.matmul %0, %1, %cst {dimension_numbers = #tpu.dot_dimension_numbers<[0], [1], [1], [0], [0, 1, 1, 0], [], []>} : vector<2x2xf32>, vector<2x2xf32>, vector<2x2xf32> -> vector<2x2xf32>
    %c0_3 = arith.constant 0 : index
    %c0_4 = arith.constant 0 : index
    %3 = vector.load %arg2[%c0_3, %c0_4] : memref<1x2xf32, #tpu.memory_space<vmem>>, vector<1x2xf32>
    %4 = vector.broadcast %3 : vector<1x2xf32> to vector<2x2xf32>
    %5 = arith.addf %2, %4 : vector<2x2xf32>
    %cst_5 = arith.constant 0.000000e+00 : f32
    %6 = vector.broadcast %cst_5 : f32 to vector<2x2xf32>
    %7 = arith.cmpf one, %5, %6 : vector<2x2xf32>
    %cst_6 = arith.constant 1.000000e+00 : f32
    %cst_7 = arith.constant 0.000000e+00 : f32
    %8 = vector.broadcast %cst_6 : f32 to vector<2x2xf32>
    %9 = vector.broadcast %cst_7 : f32 to vector<2x2xf32>
    %10 = arith.select %7, %8, %9 : vector<2x2xi1>, vector<2x2xf32>
    %11 = vector.shape_cast %10 : vector<2x2xf32> to vector<1x2x2xf32>
    %cst_8 = arith.constant dense<0.000000e+00> : vector<1xf32>
    %12 = vector.multi_reduction <add>, %11, %cst_8 [1, 2] : vector<1x2x2xf32> to vector<1xf32>
    %13 = vector.shape_cast %12 : vector<1xf32> to vector<1x1x1xf32>
    %14 = vector.extract %13[0, 0, 0] : f32 from vector<1x1x1xf32>
    %15 = vector.broadcast %14 : f32 to vector<2x2xf32>
    %16 = arith.mulf %5, %15 : vector<2x2xf32>
    %c0_9 = arith.constant 0 : index
    %c0_10 = arith.constant 0 : index
    %17 = vector.load %arg3[%c0_9, %c0_10] : memref<2x2xf32, #tpu.memory_space<vmem>>, vector<2x2xf32>
    tpu.vector_store %arg3[%c0_9, %c0_10], %16 {strides = array<i32>} : memref<2x2xf32, #tpu.memory_space<vmem>>, vector<2x2xf32>,
    return
  }
}

</mosaic_0001>

<bundles_post_ra>
// kernel: model_forward.1
= control target key start
LH: loop header
LB: loop body
LE: loop exit
PB: predicated region body
PF: predicated region fallthrough
CT: control target
= control target key end

     0   :  { %vm56_vm0 = vcmask 15360   ;;  %v202_v2 = vmov 0.0   ;;  %s248_s0 = inlined_call_operand.vmem [shape: f32[2,2], index: 0, kind: input, shape index: {}]   ;;  %s249_s1 = inlined_call_operand.vmem [shape: f32[2,2], index: 1, kind: input, shape index: {}]   ;;  %s250_s2 = inlined_call_operand.vmem [shape: f32[1,2], index: 2, kind: input, shape index: {}]   ;;  %s251_s3 = inlined_call_operand.hbm [shape: f32[2,2], index: 3, kind: output, shape index: {}]  }
   0x1   :  { %v15_v0 = vld [vmem:[%s248_s0] sm:$0x3]  ;;  %168 = vmatprep.subr.mxu0 %v202_v2 }
   0x2   :  { %v16_v1 = vld [vmem:[%s249_s1] sm:$0x3]  ;;  %24 = vxpose.xlu0.b32.start.end [1/1] (short) (narrow) %v15_v0, 8 }
   0x3   :  { %8 = vsyncpa [#allocation3], 0  ;;  %169 = vmatpush3.xpose.msk.msra.mxu0 %vm56_vm0, %v16_v1  ;;  %vm203_vm1 = vmmov 0   ;;  %v163_v4 = vld [vmem:[%s250_s2] ss:$0 sm:$0xff]  ;;  %vm135_vm2 = vcmask 9216  }
   0x4   :  { %170 = vmatprep.mubr.msk.f32.mxu0 %vm203_vm1, %v202_v2  ;;  %s204_s0 = smov [#allocation2]  }
   0x5   :  { %s155_s1 = sshll.u32 %s204_s0, 4  ;;  %s156_s1 = int_to_ptr.vmem [resolvable:$true] %s155_s1 }
   0x6   :  { %s178_s18 = scalar_lea.vmem %s156_s1, 32  ;;  %p183_p1 = scmp.lt.s32.totalorder %s156_s1, %s156_s1 }
   0x7   :  { %p179_p0 = scmp.ne.s32.totalorder %s156_s1, %s178_s18  ;;  %p184_p2 = scmp.lt.s32.totalorder %s178_s18, %s178_s18 }
   0x9   :  { %p185_p3 = por %p184_p2, %p183_p1 }
   0xb   :  { %p186_p4 = pnand %p185_p3, %p179_p0 }
  0x82   :  { %v40_v3 = vpop.trf.xlu0 }
  0x83   :  { %171 = vmatmul.mubr.msk.f32.vlgmr.msra.gmra.mrb[0].mxu0 %vm56_vm0, %v40_v3 }
 0x156   :  { %v129_v5 = vpop.f32.mrb[0].mxu0 }
 0x157   :  { %v130_v6 = vadd.f32 %v163_v4, %v129_v5  ;;  %v172_v7 = vpop.f32.mrb[1].mxu0 }
 0x159   :  { %vm133_vm3 = vcmp.ne.f32.partialorder %v130_v6, 0.0 }
 0x15a   :  { %v134_v8 = vsel %vm133_vm3, 1.0, %v202_v2 }
 0x15b   :  { %v136_v9 = vsel %vm135_vm2, %v134_v8, 0.0 }
 0x15c   :  { %137 = vadd.xlane.f32.xlu0 %v136_v9 }
 0x1e9   :  { %v138_v10 = vpop.xlane.xlu0 %137 }
 0x1ea   :  { %v139_v11 = vrot.slane %v138_v10, 4 }
 0x1ec   :  { %v140_v12 = vadd.f32 %v139_v11, %v138_v10 }
 0x1ee   :  { %v141_v13 = vrot.slane %v140_v12, 2 }
 0x1f0   :  { %v142_v14 = vadd.f32 %v141_v13, %v140_v12 }
 0x1f2   :  { %v143_v15 = vrot.slane %v142_v14, 1 }
 0x1f4   :  { %v144_v16 = vadd.f32 %v143_v15, %v142_v14 }
 0x1f6   :  { %173 = vpush %v144_v16 }
 0x227   :  { %s174_s2 = spop %173 }
 0x228   :  { %v146_v17 = vstv %s174_s2 }
 0x229   :  { %v147_v18 = vmul.f32 %v146_v17, %v130_v6 }
 0x22b   :  { %148 = vst.msk [vmem:[#allocation2] sm:$0x3] %vm135_vm2, %v147_v18 }
 0x22c   :  { %189 = shalt.err (!%p186_p4)
}
 0x22d   :  { %s190_s21 = scalar_lea.hbm %s251_s3, 32 }
 0x22e   :  { %p191_p5 = scmp.ne.s32.totalorder %s251_s3, %s190_s21  ;;  %p194_p6 = scmp.lt.u32.totalorder %s190_s21, %s251_s3 }
 0x230   :  { %p196_p7 = pnand %p194_p6, %p191_p5 }
 0x232   :  { %199 = shalt.err (!%p196_p7)
}
 0x233   :  { %158 = dma.vmem_to_hbm [thread:$0]  %s156_s1, 32, %s251_s3, [#allocation3]  }
 0x234   :  { %200 = dma.done.wait [#allocation3], 32  }
 0x235   :  { %201 = vsyncadd [#allocation3], 4294967264 }
 0x236   :  { %162 = vsyncpa [#allocation3], 1 }

</bundles_post_ra>
